<compile_context>
chip_gen: v7x
topology: tpu7x:2x2x1
jax: 0.10.0
libtpu: 0.0.40
codegen_flags: <defaults>
</compile_context>

<pallas_src>
import functools

import jax
import jax.numpy as jnp
from jax.experimental import pallas as pl
from jax.experimental.pallas import tpu as pltpu

LANE = 128     # TPU vreg lane width
SUBLANE = 8    # f32 sublane multiple


def _actor_kernel(state_ref, w1_ref, b1_ref, w2_ref, b2_ref, wh_ref, bh_ref,
                  out_ref):
    # One grid step = one complete batch (B, nS).  Weights are VMEM-resident
    # across steps (constant index_map), only state/out are re-DMA'd.
    x = state_ref[0].astype(jnp.bfloat16)                       # (B, nS) bf16

    # (B, nS) @ (nS, H1) on the MXU, f32 accumulate, f32 epilogue.
    h1 = jnp.dot(x, w1_ref[...], preferred_element_type=jnp.float32)
    h1 = jnp.maximum(h1 + b1_ref[...], 0.0)

    # (B, H1) @ (H1, H2)
    h2 = jnp.dot(h1.astype(jnp.bfloat16), w2_ref[...],
                 preferred_element_type=jnp.float32)
    h2 = jnp.maximum(h2 + b2_ref[...], 0.0)

    # All action heads fused and lane-padded: (B, H2) @ (H2, nA_pad)
    logits = jnp.dot(h2.astype(jnp.bfloat16), wh_ref[...],
                     preferred_element_type=jnp.float32)
    logits = logits + bh_ref[...]

    # Softmax over dim=0 (the batch axis of this step), per column — matches
    # F.softmax(.., dim=0).  Exact normalization (columns sum to 1).
    m = jnp.max(logits, axis=0, keepdims=True)
    e = jnp.exp(logits - m)
    s = jnp.sum(e, axis=0, keepdims=True)
    out_ref[0] = e / s


@functools.partial(jax.jit, static_argnames=("nA_total",))
def actor_forward(state, params, nA_total):
    """Fused Actor forward.

    state: (T, B, nS) rollout of T independent batches, or a single (B, nS)
           batch.  Each batch is softmax-normalized over its own dim 0,
           exactly as T separate calls to the PyTorch module.
    params: output of prepare_params() (bf16 weights, f32 biases, lane-padded
            fused head).
    """
    w1, b1, w2, b2, wh, bh = params

    squeeze = state.ndim == 2
    if squeeze:
        state = state[None]
    T, B, nS = state.shape
    H1 = w1.shape[1]
    H2 = w2.shape[1]
    nA_pad = wh.shape[1]

    if B % SUBLANE != 0:
        # TODO(synk): for B not a multiple of 8, pad rows and mask their logits
        # to -inf so the dim=0 softmax denominator is unaffected.
        raise ValueError(f"batch {B} must be a multiple of {SUBLANE}")

    # Advisory cost estimate so XLA can schedule around this small call.
    flops = 2 * T * B * (nS * H1 + H1 * H2 + H2 * nA_pad)
    transcendentals = T * B * nA_pad  # exp in the softmax
    nbytes = lambda a: a.size * a.dtype.itemsize
    bytes_accessed = (nbytes(state) + nbytes(w1) + nbytes(b1) + nbytes(w2)
                      + nbytes(b2) + nbytes(wh) + nbytes(bh)
                      + 4 * T * B * nA_pad)

    # Weights/biases: full block, constant index -> fetched once, kept in VMEM.
    weight_spec = lambda a: pl.BlockSpec(a.shape, lambda t: (0,) * a.ndim)

    out = pl.pallas_call(
        _actor_kernel,
        out_shape=jax.ShapeDtypeStruct((T, B, nA_pad), jnp.float32),
        grid=(T,),
        in_specs=[
            pl.BlockSpec((1, B, nS), lambda t: (t, 0, 0)),   # state (per step)
            weight_spec(w1), weight_spec(b1),
            weight_spec(w2), weight_spec(b2),
            weight_spec(wh), weight_spec(bh),
        ],
        out_specs=pl.BlockSpec((1, B, nA_pad), lambda t: (t, 0, 0)),
        compiler_params=pltpu.CompilerParams(
            dimension_semantics=("parallel",)),               # v7x: 2 TCs
        cost_estimate=pl.CostEstimate(flops=flops,
                                      transcendentals=transcendentals,
                                      bytes_accessed=bytes_accessed),
    )(state, w1, b1, w2, b2, wh, bh)

    # Drop the padded (meaningless) head columns; fuses under jit.
    out = out[:, :, :nA_total]
    return out[0] if squeeze else out


def make_params(key, nS, hidden_dims, indicies):
    """Deterministic f32 parameter init mirroring the module's shapes.

    hidden_init in the reference uses fan_in = weight.size()[0] (PyTorch weight
    is (out, in), so this is actually out_features); we reproduce that limit.
    """
    H1, H2 = hidden_dims
    head_sizes = [hi - lo for (lo, hi) in indicies]
    nA_total = sum(head_sizes)

    k1, k2, k3, k4, k5 = jax.random.split(key, 5)

    lim1 = 1.0 / jnp.sqrt(jnp.float32(H1))
    lim2 = 1.0 / jnp.sqrt(jnp.float32(H2))

    # Stored as (in, out) for x @ W.
    w1 = jax.random.uniform(k1, (nS, H1), jnp.float32, -lim1, lim1)
    b1 = jax.random.uniform(k2, (1, H1), jnp.float32, -lim1, lim1)
    w2 = jax.random.uniform(k3, (H1, H2), jnp.float32, -lim2, lim2)
    b2 = jax.random.uniform(k4, (1, H2), jnp.float32, -lim2, lim2)

    # Action-head layers: PyTorch default Linear init (±1/sqrt(fan_in)).
    limh = 1.0 / jnp.sqrt(jnp.float32(H2))
    kh_w, kh_b = jax.random.split(k5)
    wh = jax.random.uniform(kh_w, (H2, nA_total), jnp.float32, -limh, limh)
    bh = jax.random.uniform(kh_b, (1, nA_total), jnp.float32, -limh, limh)
    return w1, b1, w2, b2, wh, bh


def prepare_params(w1, b1, w2, b2, wh, bh):
    """One-time device-ready params: lane-pad the fused head, bf16 weights.

    Padded head columns have zero weight/bias (benign uniform softmax columns,
    sliced off in actor_forward).  Biases stay f32 for the f32 epilogues.
    """
    H2, nA_total = wh.shape
    nA_pad = LANE * pl.cdiv(nA_total, LANE)
    if nA_pad != nA_total:
        wh = jnp.zeros((H2, nA_pad), wh.dtype).at[:, :nA_total].set(wh)
        bh = jnp.zeros((1, nA_pad), bh.dtype).at[:, :nA_total].set(bh)
    prepared = (w1.astype(jnp.bfloat16), b1.astype(jnp.float32),
                w2.astype(jnp.bfloat16), b2.astype(jnp.float32),
                wh.astype(jnp.bfloat16), bh.astype(jnp.float32))
    return prepared, nA_total


def reference_forward(state, prepared, indicies):
    """Pure-JAX f32 reference matching the PyTorch per-head loop exactly,
    using the same (bf16-stored) weights upcast to f32."""
    w1, b1, w2, b2, wh, bh = [p.astype(jnp.float32) for p in prepared]

    def one_step(s):
        x = jnp.maximum(s @ w1 + b1, 0.0)
        x = jnp.maximum(x @ w2 + b2, 0.0)
        outs = []
        col = 0
        for (lo, hi) in indicies:
            sz = hi - lo
            logits = x @ wh[:, col:col + sz] + bh[:, col:col + sz]
            outs.append(jax.nn.softmax(logits, axis=0))   # dim=0, as in module
            col += sz
        return jnp.concatenate(outs, axis=-1)

    return jnp.stack([one_step(state[t]) for t in range(state.shape[0])])


if __name__ == "__main__":
    # Module-consistent shapes: nS=32, hidden_dims=(256,128) (module default),
    # 3 action heads -> nA = 16.  Per the perf review, the call amortizes the
    # weight DMA across T=8 rollout steps of B=128 rows each.
    T, B = 8, 128
    nS = 32
    hidden_dims = (256, 128)
    indicies = [(0, 4), (4, 10), (10, 16)]   # head sizes 4, 6, 6
    nA_total = sum(hi - lo for lo, hi in indicies)

    key = jax.random.PRNGKey(0)
    k_state, k_params = jax.random.split(key)

    state = jax.random.normal(k_state, (T, B, nS), jnp.float32)
    raw_params = make_params(k_params, nS, hidden_dims, indicies)
    params, nA_from_params = prepare_params(*raw_params)
    assert nA_from_params == nA_total

    out = actor_forward(state, params, nA_total=nA_total)
    out = jax.block_until_ready(out)

    ref = reference_forward(state, params, indicies)
    assert out.shape == (T, B, nA_total)
    # bf16 matmul operands (f32 accumulate) vs f32 reference on same weights.
    assert jnp.allclose(out, ref, atol=2e-3, rtol=2e-2), "mismatch vs reference"
    # Exact reciprocal: each column sums to 1 across its batch (dim=0 softmax).
    assert jnp.allclose(jnp.sum(out, axis=1), jnp.ones((T, nA_total)),
                        atol=1e-4)

    print("KERNEL_OK")
</pallas_src>

<mosaic_0001>
module attributes {stable_mosaic.version = 11 : i64} {
  func.func @_actor_kernel(%arg0: i32, %arg1: memref<1x128x32xf32, #tpu.memory_space<vmem>>, %arg2: memref<32x256xbf16, #tpu.memory_space<vmem>>, %arg3: memref<1x256xf32, #tpu.memory_space<vmem>>, %arg4: memref<256x128xbf16, #tpu.memory_space<vmem>>, %arg5: memref<1x128xf32, #tpu.memory_space<vmem>>, %arg6: memref<128x128xbf16, #tpu.memory_space<vmem>>, %arg7: memref<1x128xf32, #tpu.memory_space<vmem>>, %arg8: memref<1x128x128xf32, #tpu.memory_space<vmem>>) attributes {dimension_semantics = [#tpu.dimension_semantics<parallel>], iteration_bounds = array<i64: 8>, scalar_prefetch = 0 : i64, scratch_operands = 0 : i64, tpu.core_type = #tpu.core_type<tc>, window_params = [{transform_indices = @transform_0, window_bounds = array<i64: 1, 128, 32>}, {pipeline_mode = #tpu.pipeline_mode<synchronous>, transform_indices = @transform_1, window_bounds = array<i64: 32, 256>}, {pipeline_mode = #tpu.pipeline_mode<synchronous>, transform_indices = @transform_2, window_bounds = array<i64: 1, 256>}, {pipeline_mode = #tpu.pipeline_mode<synchronous>, transform_indices = @transform_3, window_bounds = array<i64: 256, 128>}, {pipeline_mode = #tpu.pipeline_mode<synchronous>, transform_indices = @transform_4, window_bounds = array<i64: 1, 128>}, {pipeline_mode = #tpu.pipeline_mode<synchronous>, transform_indices = @transform_5, window_bounds = array<i64: 128, 128>}, {pipeline_mode = #tpu.pipeline_mode<synchronous>, transform_indices = @transform_6, window_bounds = array<i64: 1, 128>}, {transform_indices = @transform_7, window_bounds = array<i64: 1, 128, 128>}]} {
    %c0 = arith.constant 0 : index
    %c0_0 = arith.constant 0 : index
    %c0_1 = arith.constant 0 : index
    %0 = vector.load %arg1[%c0, %c0_0, %c0_1] : memref<1x128x32xf32, #tpu.memory_space<vmem>>, vector<1x128x32xf32>
    %1 = vector.shape_cast %0 : vector<1x128x32xf32> to vector<128x32xf32>
    %2 = arith.truncf %1 : vector<128x32xf32> to vector<128x32xbf16>
    %c0_2 = arith.constant 0 : index
    %c0_3 = arith.constant 0 : index
    %3 = vector.load %arg2[%c0_2, %c0_3] : memref<32x256xbf16, #tpu.memory_space<vmem>>, vector<32x256xbf16>
    %cst = arith.constant dense<0.000000e+00> : vector<128x256xf32>
    %4 = tpu.matmul %2, %3, %cst {dimension_numbers = #tpu.dot_dimension_numbers<[1], [0], [0], [1], [0, 0, 1, 1], [], []>} : vector<128x32xbf16>, vector<32x256xbf16>, vector<128x256xf32> -> vector<128x256xf32>
    %c0_4 = arith.constant 0 : index
    %c0_5 = arith.constant 0 : index
    %5 = vector.load %arg3[%c0_4, %c0_5] : memref<1x256xf32, #tpu.memory_space<vmem>>, vector<1x256xf32>
    %6 = vector.broadcast %5 : vector<1x256xf32> to vector<128x256xf32>
    %7 = arith.addf %4, %6 : vector<128x256xf32>
    %cst_6 = arith.constant 0.000000e+00 : f32
    %8 = vector.broadcast %cst_6 : f32 to vector<128x256xf32>
    %9 = arith.maximumf %7, %8 : vector<128x256xf32>
    %10 = arith.truncf %9 : vector<128x256xf32> to vector<128x256xbf16>
    %c0_7 = arith.constant 0 : index
    %c0_8 = arith.constant 0 : index
    %11 = vector.load %arg4[%c0_7, %c0_8] : memref<256x128xbf16, #tpu.memory_space<vmem>>, vector<256x128xbf16>
    %cst_9 = arith.constant dense<0.000000e+00> : vector<128x128xf32>
    %12 = tpu.matmul %10, %11, %cst_9 {dimension_numbers = #tpu.dot_dimension_numbers<[1], [0], [0], [1], [0, 0, 1, 1], [], []>} : vector<128x256xbf16>, vector<256x128xbf16>, vector<128x128xf32> -> vector<128x128xf32>
    %c0_10 = arith.constant 0 : index
    %c0_11 = arith.constant 0 : index
    %13 = vector.load %arg5[%c0_10, %c0_11] : memref<1x128xf32, #tpu.memory_space<vmem>>, vector<1x128xf32>
    %14 = vector.broadcast %13 : vector<1x128xf32> to vector<128x128xf32>
    %15 = arith.addf %12, %14 : vector<128x128xf32>
    %cst_12 = arith.constant 0.000000e+00 : f32
    %16 = vector.broadcast %cst_12 : f32 to vector<128x128xf32>
    %17 = arith.maximumf %15, %16 : vector<128x128xf32>
    %18 = arith.truncf %17 : vector<128x128xf32> to vector<128x128xbf16>
    %c0_13 = arith.constant 0 : index
    %c0_14 = arith.constant 0 : index
    %19 = vector.load %arg6[%c0_13, %c0_14] : memref<128x128xbf16, #tpu.memory_space<vmem>>, vector<128x128xbf16>
    %cst_15 = arith.constant dense<0.000000e+00> : vector<128x128xf32>
    %20 = tpu.matmul %18, %19, %cst_15 {dimension_numbers = #tpu.dot_dimension_numbers<[1], [0], [0], [1], [0, 0, 1, 1], [], []>} : vector<128x128xbf16>, vector<128x128xbf16>, vector<128x128xf32> -> vector<128x128xf32>
    %c0_16 = arith.constant 0 : index
    %c0_17 = arith.constant 0 : index
    %21 = vector.load %arg7[%c0_16, %c0_17] : memref<1x128xf32, #tpu.memory_space<vmem>>, vector<1x128xf32>
    %22 = vector.broadcast %21 : vector<1x128xf32> to vector<128x128xf32>
    %23 = arith.addf %20, %22 : vector<128x128xf32>
    %cst_18 = arith.constant dense<0xFF800000> : vector<128xf32>
    %24 = vector.multi_reduction <maximumf>, %23, %cst_18 [0] : vector<128x128xf32> to vector<128xf32>
    %25 = vector.shape_cast %24 : vector<128xf32> to vector<1x128xf32>
    %26 = vector.broadcast %25 : vector<1x128xf32> to vector<128x128xf32>
    %27 = arith.subf %23, %26 : vector<128x128xf32>
    %28 = math.exp %27 : vector<128x128xf32>
    %cst_19 = arith.constant dense<0.000000e+00> : vector<128xf32>
    %29 = vector.multi_reduction <add>, %28, %cst_19 [0] : vector<128x128xf32> to vector<128xf32>
    %30 = vector.shape_cast %29 : vector<128xf32> to vector<1x128xf32>
    %31 = vector.broadcast %30 : vector<1x128xf32> to vector<128x128xf32>
    %32 = arith.divf %28, %31 : vector<128x128xf32>
    %c0_20 = arith.constant 0 : index
    %c0_21 = arith.constant 0 : index
    %c0_22 = arith.constant 0 : index
    %33 = vector.load %arg8[%c0_20, %c0_21, %c0_22] : memref<1x128x128xf32, #tpu.memory_space<vmem>>, vector<1x128x128xf32>
    %34 = vector.shape_cast %33 : vector<1x128x128xf32> to vector<128x128xf32>
    %35 = vector.shape_cast %32 : vector<128x128xf32> to vector<1x128x128xf32>
    tpu.vector_store %arg8[%c0_20, %c0_21, %c0_22], %35 {strides = array<i32>} : memref<1x128x128xf32, #tpu.memory_space<vmem>>, vector<1x128x128xf32>,
    return
  }
  func.func @transform_0(%arg0: i32) -> (i32, i32, i32) {
    %c0_i32 = arith.constant 0 : i32
    %c0_i32_0 = arith.constant 0 : i32
    %c0_i32_1 = arith.constant 0 : i32
    return %arg0, %c0_i32, %c0_i32_0 : i32, i32, i32
  }
  func.func @transform_1(%arg0: i32) -> (i32, i32) {
    %c0_i32 = arith.constant 0 : i32
    %c0_i32_0 = arith.constant 0 : i32
    %c0_i32_1 = arith.constant 0 : i32
    return %c0_i32, %c0_i32_0 : i32, i32
  }
  func.func @transform_2(%arg0: i32) -> (i32, i32) {
    %c0_i32 = arith.constant 0 : i32
    %c0_i32_0 = arith.constant 0 : i32
    %c0_i32_1 = arith.constant 0 : i32
    return %c0_i32, %c0_i32_0 : i32, i32
  }
  func.func @transform_3(%arg0: i32) -> (i32, i32) {
    %c0_i32 = arith.constant 0 : i32
    %c0_i32_0 = arith.constant 0 : i32
    %c0_i32_1 = arith.constant 0 : i32
    return %c0_i32, %c0_i32_0 : i32, i32
  }
  func.func @transform_4(%arg0: i32) -> (i32, i32) {
    %c0_i32 = arith.constant 0 : i32
    %c0_i32_0 = arith.constant 0 : i32
    %c0_i32_1 = arith.constant 0 : i32
    return %c0_i32, %c0_i32_0 : i32, i32
  }
  func.func @transform_5(%arg0: i32) -> (i32, i32) {
    %c0_i32 = arith.constant 0 : i32
    %c0_i32_0 = arith.constant 0 : i32
    %c0_i32_1 = arith.constant 0 : i32
    return %c0_i32, %c0_i32_0 : i32, i32
  }
  func.func @transform_6(%arg0: i32) -> (i32, i32) {
    %c0_i32 = arith.constant 0 : i32
    %c0_i32_0 = arith.constant 0 : i32
    %c0_i32_1 = arith.constant 0 : i32
    return %c0_i32, %c0_i32_0 : i32, i32
  }
  func.func @transform_7(%arg0: i32) -> (i32, i32, i32) {
    %c0_i32 = arith.constant 0 : i32
    %c0_i32_0 = arith.constant 0 : i32
    %c0_i32_1 = arith.constant 0 : i32
    return %arg0, %c0_i32, %c0_i32_0 : i32, i32, i32
  }
}

</mosaic_0001>

<bundles_post_ra>
// kernel: actor_forward.1
= control target key start
LH: loop header
LB: loop body
LE: loop exit
PB: predicated region body
PF: predicated region fallthrough
CT: control target
= control target key end

     0   :  { %s1413_s24 = smov 0   ;;  %s1684_s0 = inlined_call_operand.vmem [shape: f32[8,128,32], index: 0, kind: input, shape index: {}]   ;;  %s1685_s1 = inlined_call_operand.vmem [shape: bf16[32,256], index: 1, kind: input, shape index: {}]   ;;  %s1686_s2 = inlined_call_operand.vmem [shape: f32[1,256], index: 2, kind: input, shape index: {}]   ;;  %s1687_s3 = inlined_call_operand.vmem [shape: bf16[256,128], index: 3, kind: input, shape index: {}]   ;;  %s1688_s4 = inlined_call_operand.vmem [shape: f32[1,128], index: 4, kind: input, shape index: {}]   ;;  %s1689_s5 = inlined_call_operand.vmem [shape: bf16[128,128], index: 5, kind: input, shape index: {}]   ;;  %s1690_s6 = inlined_call_operand.vmem [shape: f32[1,128], index: 6, kind: input, shape index: {}]   ;;  %s1691_s7 = inlined_call_operand.vmem [shape: f32[8,128,128], index: 7, kind: output, shape index: {}]  }
   0x1 LB: > { %s1128_s25 = sadd.s32 4294967295, %s1370_s24   ;;  %p1132_p0 = scmp.ge.s32.totalorder %s1370_s24, 1  ;;  %s1370_s24 = sphi %s1413_s24, %s17_s24  }
   0x2   : > { %p237_p1 = scmp.lt.s32.totalorder %s1370_s24, 9 }
   0x4   : > { %p238_p2 = pnand %p1132_p0, %p237_p1 }
   0x5   : > { %v1300_v0 = vld [vmem:[%s1685_s1 + $0x4] ss:$8 sps:$4 sm:$0xff] (!%p238_p2)   ;;  %p269_p3 = scmp.lt.s32.totalorder (!%p238_p2), %s1128_s25, 7  ;;  %v1302_v1 = vld [vmem:[%s1685_s1] ss:$8 sps:$4 sm:$0xff] (!%p238_p2)   ;;  %v1372_v2 = vmov (!%p238_p2), 0   ;;  %v310_v48 = vlaneseq (!%p238_p2) }
   0x6   : > { %241 = sbr.rel (%p238_p2) target bundleno = 837 (0x345), region = 48  ;;  %397 = vmatprep.mubr.bf16.mxu0 (!%p238_p2), %v1372_v2  ;;  %365 = vmatprep.subr.bf16.mxu0 (!%p238_p2), %v1300_v0  ;;  %v1303_v3 = vld [vmem:[%s1685_s1 + $0x14] ss:$8 sps:$4 sm:$0xff] (!%p238_p2)   ;;  %v1305_v4 = vld [vmem:[%s1685_s1 + $0x10] ss:$8 sps:$4 sm:$0xff] (!%p238_p2)   ;;  %v1306_v5 = vld [vmem:[%s1687_s3 + $0x40] sm:$0xff] (!%p238_p2)  }
   0x7   : > { %366 = vmatpush1.bf16.msra.mxu0 (!%p238_p2), %v1302_v1  ;;  %1179 = vmatprep.subr.bf16.mxu1 (!%p238_p2), %v1306_v5  ;;  %v1307_v6 = vld [vmem:[%s1687_s3] sm:$0xff] (!%p238_p2)   ;;  %v1308_v7 = vld [vmem:[%s1687_s3 + $0x48] sm:$0xff] (!%p238_p2)   ;;  %vm340_vm0 = vcmask (!%p238_p2), 261120   ;;  %v1310_v14 = vld [vmem:[%s1687_s3 + $0x50] sm:$0xff] (!%p238_p2)   ;;  %v311_v49 = vshrl.u32 (!%p238_p2), %v310_v48, 7 }
   0x8   : > { %367 = vmatprep.subr.bf16.mxu0 (!%p238_p2), %v1303_v3  ;;  %1180 = vmatpush3.bf16.msra.mxu1 (!%p238_p2), %v1307_v6  ;;  %v1309_v13 = vld [vmem:[%s1687_s3 + $0x8] sm:$0xff] (!%p238_p2)   ;;  %v1311_v15 = vld [vmem:[%s1687_s3 + $0x10] sm:$0xff] (!%p238_p2)   ;;  %v1312_v17 = vld [vmem:[%s1687_s3 + $0x58] sm:$0xff] (!%p238_p2)  }
   0x9   : > { %1181 = vmatprep.subr.bf16.mxu1 (!%p238_p2), %v1308_v7  ;;  %v1313_v20 = vld [vmem:[%s1687_s3 + $0x18] sm:$0xff] (!%p238_p2)   ;;  %v1314_v21 = vld [vmem:[%s1687_s3 + $0x60] sm:$0xff] (!%p238_p2)   ;;  %v1316_v23 = vld [vmem:[%s1687_s3 + $0x68] sm:$0xff] (!%p238_p2)   ;;  %v312_v50 = vsub.s32 (!%p238_p2), 0, %v311_v49  ;;  %v316_v52 = vsub.s32 (!%p238_p2), 1, %v311_v49 }
   0xa   : > { %v1315_v22 = vld [vmem:[%s1687_s3 + $0x20] sm:$0xff] (!%p238_p2)   ;;  %v1317_v40 = vld [vmem:[%s1687_s3 + $0x28] sm:$0xff] (!%p238_p2)   ;;  %v1318_v41 = vld [vmem:[%s1687_s3 + $0x70] sm:$0xff] (!%p238_p2)  }
   0xb   : > { %368 = vmatpush1.bf16.msra.mxu0 (!%p238_p2), %v1305_v4  ;;  %v1319_v42 = vld [vmem:[%s1687_s3 + $0x30] sm:$0xff] (!%p238_p2)   ;;  %v1320_v43 = vld [vmem:[%s1687_s3 + $0x78] sm:$0xff] (!%p238_p2)   ;;  %v1322_v45 = vld [vmem:[%s1689_s5] sm:$0xff] (!%p238_p2)  }
   0xc   : > { %1182 = vmatpush3.bf16.msra.mxu1 (!%p238_p2), %v1309_v13  ;;  %v1321_v44 = vld [vmem:[%s1687_s3 + $0x38] sm:$0xff] (!%p238_p2)   ;;  %v1323_v46 = vld [vmem:[%s1689_s5 + $0x8] sm:$0xff] (!%p238_p2)   ;;  %1259 = vmatprep.subr.bf16.mxu0 (!%p238_p2), %v1322_v45  ;;  %v1324_v47 = vld [vmem:[%s1689_s5 + $0x10] sm:$0xff] (!%p238_p2)  }
   0xd   : > { %s1693_s25 = smov (!%p269_p3, %s1128_s25), 7  ;;  %1183 = vmatprep.subr.bf16.mxu1 %v1310_v14  ;;  %v308_v51 = vld [vmem:[%s1686_s2] sm:$0x3] }
   0xe   : > { %s1177_s13 = sshll.u32 %s1693_s25, 7  ;;  %v1535_v53 = vrot.slane %v308_v51, %v312_v50  ;;  %v1537_v54 = vrot.slane %v308_v51, %v316_v52 }
   0xf   : > { %s1448_s18 = scalar_lea.vmem %s1684_s0, %s1177_s13  ;;  %s1663_s10 = scalar_lea.vmem %s1691_s7, %s1177_s13 }
  0x10   : > { %v280_v8 = vld [vmem:[%s1448_s18] sm:$0xff]  ;;  %v281_v9 = vld [vmem:[%s1448_s18 + $0x8] sm:$0xff]  ;;  %v282_v11 = vld [vmem:[%s1448_s18 + $0x10] sm:$0xff]  ;;  %1184 = vmatpush3.bf16.msra.mxu1 %v1311_v15 }
  0x11   : > { %v296_v10 = vpack.c.bf16 %v281_v9, %v280_v8  ;;  %v283_v12 = vld [vmem:[%s1448_s18 + $0x18] sm:$0xff]  ;;  %v284_v18 = vld [vmem:[%s1448_s18 + $0x20] sm:$0xff]  ;;  %v285_v19 = vld [vmem:[%s1448_s18 + $0x28] sm:$0xff]  ;;  %1185 = vmatprep.subr.bf16.mxu1 %v1312_v17 }
  0x12   : > { %v297_v16 = vpack.c.bf16 %v283_v12, %v282_v11  ;;  %v298_v24 = vpack.c.bf16 %v285_v19, %v284_v18  ;;  %v286_v25 = vld [vmem:[%s1448_s18 + $0x30] sm:$0xff]  ;;  %v287_v26 = vld [vmem:[%s1448_s18 + $0x38] sm:$0xff]  ;;  %v288_v28 = vld [vmem:[%s1448_s18 + $0x40] sm:$0xff] }
  0x13   : > { %1141 = vmatmul.mubr.msk.bf16.vlgmr.msra.gmra.mrb[0].mxu0 %vm340_vm0, %v296_v10  ;;  %v299_v27 = vpack.c.bf16 %v287_v26, %v286_v25  ;;  %v289_v29 = vld [vmem:[%s1448_s18 + $0x48] sm:$0xff]  ;;  %v290_v31 = vld [vmem:[%s1448_s18 + $0x50] sm:$0xff]  ;;  %v291_v32 = vld [vmem:[%s1448_s18 + $0x58] sm:$0xff] }
  0x14   : > { %407 = vmatprep.mubr.bf16.mxu0 %v1372_v2  ;;  %1186 = vmatpush3.bf16.msra.mxu1 %v1313_v20  ;;  %v300_v30 = vpack.c.bf16 %v289_v29, %v288_v28  ;;  %v301_v33 = vpack.c.bf16 %v291_v32, %v290_v31  ;;  %v292_v34 = vld [vmem:[%s1448_s18 + $0x60] sm:$0xff]  ;;  %v293_v35 = vld [vmem:[%s1448_s18 + $0x68] sm:$0xff]  ;;  %v294_v37 = vld [vmem:[%s1448_s18 + $0x70] sm:$0xff] }
  0x15   : > { %1187 = vmatprep.subr.bf16.mxu1 %v1314_v21  ;;  %v302_v36 = vpack.c.bf16 %v293_v35, %v292_v34  ;;  %v295_v38 = vld [vmem:[%s1448_s18 + $0x78] sm:$0xff]  ;;  %1260 = vmatpush3.bf16.msra.mxu0 %v1322_v45 }
  0x16   : > { %v303_v39 = vpack.c.bf16 %v295_v38, %v294_v37  ;;  %1261 = vmatprep.subr.bf16.mxu0 %v1323_v46 }
  0x18   : > { %1188 = vmatpush3.bf16.msra.mxu1 %v1315_v22 }
  0x19   : > { %1189 = vmatprep.subr.bf16.mxu1 %v1316_v23  ;;  %1262 = vmatpush3.bf16.msra.mxu0 %v1323_v46 }
  0x1a   : > { %1263 = vmatprep.subr.bf16.mxu0 %v1324_v47 }
  0x1b   : > { %1142 = vmatmul.mubr.msk.bf16.gmra.mrb[4].mxu0 %vm340_vm0, %v297_v16 }
  0x1c   : > { %417 = vmatprep.mubr.bf16.mxu0 %v1372_v2  ;;  %1190 = vmatpush3.bf16.msra.mxu1 %v1317_v40 }
  0x1d   : > { %1191 = vmatprep.subr.bf16.mxu1 %v1318_v41  ;;  %1264 = vmatpush3.bf16.msra.mxu0 %v1324_v47 }
  0x20   : > { %1192 = vmatpush3.bf16.msra.mxu1 %v1319_v42 }
  0x21   : > { %1193 = vmatprep.subr.bf16.mxu1 %v1320_v43 }
  0x23   : > { %1143 = vmatmul.mubr.msk.bf16.gmra.mrb[8].mxu0 %vm340_vm0, %v298_v24 }
  0x24   : > { %427 = vmatprep.mubr.bf16.mxu0 %v1372_v2  ;;  %1194 = vmatpush3.bf16.msra.mxu1 %v1321_v44 }
  0x2b   : > { %1144 = vmatmul.mubr.msk.bf16.gmra.mrb[12].mxu0 %vm340_vm0, %v299_v27 }
  0x2c   : > { %437 = vmatprep.mubr.bf16.mxu0 %v1372_v2 }
  0x33   : > { %1145 = vmatmul.mubr.msk.bf16.gmra.mrb[16].mxu0 %vm340_vm0, %v300_v30 }
  0x34   : > { %447 = vmatprep.mubr.bf16.mxu0 %v1372_v2 }
  0x3b   : > { %1146 = vmatmul.mubr.msk.bf16.gmra.mrb[20].mxu0 %vm340_vm0, %v301_v33 }
  0x3c   : > { %457 = vmatprep.mubr.bf16.mxu0 %v1372_v2 }
  0x43   : > { %1147 = vmatmul.mubr.msk.bf16.gmra.mrb[24].mxu0 %vm340_vm0, %v302_v36 }
  0x44   : > { %467 = vmatprep.mubr.bf16.mxu0 %v1372_v2 }
  0x4b   : > { %1148 = vmatmul.mubr.msk.bf16.gmra.mrb[28].mxu0 %vm340_vm0, %v303_v39 }
  0xe6   : > { %v399_v55 = vpop.f32.mrb[0].mxu0 }
  0xe7   : > { %v400_v56 = vadd.f32 %v399_v55, %v1535_v53  ;;  %v401_v57 = vpop.f32.mrb[1].mxu0 }
  0xe8   : > { %v402_v58 = vadd.f32 %v401_v57, %v1537_v54  ;;  %v403_v59 = vpop.f32.mrb[2].mxu0 }
  0xe9   : > { %v404_v60 = vadd.f32 %v403_v59, %v1535_v53  ;;  %v405_v61 = vpop.f32.mrb[3].mxu0  ;;  %v478_v63 = vmax.f32 %v400_v56, 0.0 }
  0xea   : > { %v406_v62 = vadd.f32 %v405_v61, %v1537_v54  ;;  %v479_v1 = vmax.f32 %v402_v58, 0.0 }
  0xeb   : > { %v480_v0 = vmax.f32 %v404_v60, 0.0 }
  0xec   : > { %v481_v2 = vmax.f32 %v406_v62, 0.0 }
  0xed   : > { %v510_v3 = vpack.c.bf16 %v480_v0, %v478_v63 }
  0xee   : > { %v409_v4 = vpop.f32.mrb[4].mxu0  ;;  %v511_v5 = vpack.c.bf16 %v481_v2, %v479_v1 }
  0xef   : > { %v410_v6 = vadd.f32 %v409_v4, %v1535_v53  ;;  %v411_v7 = vpop.f32.mrb[5].mxu0 }
  0xf0   : > { %v412_v8 = vadd.f32 %v411_v7, %v1537_v54  ;;  %v413_v9 = vpop.f32.mrb[6].mxu0  ;;  %693 = vmatprep.mubr.bf16.mxu1 %v511_v5 }
  0xf1   : > { %v414_v10 = vadd.f32 %v413_v9, %v1535_v53  ;;  %v415_v11 = vpop.f32.mrb[7].mxu0  ;;  %694 = vmatmul.mubr.bf16.vlgmr.msra.gmra.mrb[0].mxu1 %v510_v3  ;;  %v482_v13 = vmax.f32 %v410_v6, 0.0 }
  0xf2   : > { %v416_v12 = vadd.f32 %v415_v11, %v1537_v54  ;;  %v483_v15 = vmax.f32 %v412_v8, 0.0 }
  0xf3   : > { %v484_v14 = vmax.f32 %v414_v10, 0.0 }
  0xf4   : > { %v485_v16 = vmax.f32 %v416_v12, 0.0 }
  0xf5   : > { %v512_v17 = vpack.c.bf16 %v484_v14, %v482_v13 }
  0xf6   : > { %v513_v18 = vpack.c.bf16 %v485_v16, %v483_v15  ;;  %v419_v19 = vpop.f32.mrb[8].mxu0 }
  0xf7   : > { %v420_v20 = vadd.f32 %v419_v19, %v1535_v53  ;;  %v421_v21 = vpop.f32.mrb[9].mxu0 }
  0xf8   : > { %v422_v22 = vadd.f32 %v421_v21, %v1537_v54  ;;  %v423_v23 = vpop.f32.mrb[10].mxu0  ;;  %701 = vmatprep.mubr.bf16.mxu1 %v513_v18 }
  0xf9   : > { %v424_v24 = vadd.f32 %v423_v23, %v1535_v53  ;;  %v425_v25 = vpop.f32.mrb[11].mxu0  ;;  %702 = vmatmul.mubr.bf16.gmra.mrb[4].mxu1 %v512_v17  ;;  %v486_v27 = vmax.f32 %v420_v20, 0.0 }
  0xfa   : > { %v426_v26 = vadd.f32 %v425_v25, %v1537_v54  ;;  %v487_v29 = vmax.f32 %v422_v22, 0.0 }
  0xfb   : > { %v488_v28 = vmax.f32 %v424_v24, 0.0 }
  0xfc   : > { %v489_v30 = vmax.f32 %v426_v26, 0.0 }
  0xfd   : > { %v514_v31 = vpack.c.bf16 %v488_v28, %v486_v27 }
  0xfe   : > { %v515_v32 = vpack.c.bf16 %v489_v30, %v487_v29  ;;  %v429_v33 = vpop.f32.mrb[12].mxu0 }
  0xff   : > { %v430_v34 = vadd.f32 %v429_v33, %v1535_v53  ;;  %v431_v35 = vpop.f32.mrb[13].mxu0 }
 0x100   : > { %v432_v36 = vadd.f32 %v431_v35, %v1537_v54  ;;  %v433_v37 = vpop.f32.mrb[14].mxu0  ;;  %709 = vmatprep.mubr.bf16.mxu1 %v515_v32 }
 0x101   : > { %v434_v38 = vadd.f32 %v433_v37, %v1535_v53  ;;  %v435_v39 = vpop.f32.mrb[15].mxu0  ;;  %710 = vmatmul.mubr.bf16.gmra.mrb[8].mxu1 %v514_v31  ;;  %v490_v41 = vmax.f32 %v430_v34, 0.0 }
 0x102   : > { %v436_v40 = vadd.f32 %v435_v39, %v1537_v54  ;;  %v491_v43 = vmax.f32 %v432_v36, 0.0 }
 0x103   : > { %v492_v42 = vmax.f32 %v434_v38, 0.0 }
 0x104   : > { %v493_v44 = vmax.f32 %v436_v40, 0.0 }
 0x105   : > { %v516_v45 = vpack.c.bf16 %v492_v42, %v490_v41  ;;  %v1325_v41 = vld [vmem:[%s1689_s5 + $0x18] sm:$0xff]   ;;  %v1328_v42 = vld [vmem:[%s1689_s5 + $0x30] sm:$0xff]  }
 0x106   : > { %v517_v46 = vpack.c.bf16 %v493_v44, %v491_v43  ;;  %v439_v47 = vpop.f32.mrb[16].mxu0  ;;  %1265 = vmatprep.subr.bf16.mxu0 %v1325_v41  ;;  %v1329_v43 = vld [vmem:[%s1689_s5 + $0x38] sm:$0xff]  }
 0x107   : > { %v440_v48 = vadd.f32 %v439_v47, %v1535_v53  ;;  %v441_v49 = vpop.f32.mrb[17].mxu0  ;;  %1266 = vmatpush3.bf16.msra.mxu0 %v1325_v41 }
 0x108   : > { %v442_v50 = vadd.f32 %v441_v49, %v1537_v54  ;;  %v443_v51 = vpop.f32.mrb[18].mxu0  ;;  %717 = vmatprep.mubr.bf16.mxu1 %v517_v46 }
 0x109   : > { %v444_v52 = vadd.f32 %v443_v51, %v1535_v53  ;;  %v445_v55 = vpop.f32.mrb[19].mxu0  ;;  %718 = vmatmul.mubr.bf16.gmra.mrb[12].mxu1 %v516_v45  ;;  %v494_v57 = vmax.f32 %v440_v48, 0.0  ;;  %v1589_v45 = vld [vmem:[%s1688_s4] ss:$0 sm:$0xff] }
 0x10a   : > { %v446_v56 = vadd.f32 %v445_v55, %v1537_v54  ;;  %v495_v59 = vmax.f32 %v442_v50, 0.0 }
 0x10b   : > { %v496_v58 = vmax.f32 %v444_v52, 0.0 }
 0x10c   : > { %v497_v60 = vmax.f32 %v446_v56, 0.0 }
 0x10d   : > { %v518_v61 = vpack.c.bf16 %v496_v58, %v494_v57 }
 0x10e   : > { %v519_v62 = vpack.c.bf16 %v497_v60, %v495_v59  ;;  %v449_v63 = vpop.f32.mrb[20].mxu0 }
 0x10f   : > { %v450_v0 = vadd.f32 %v449_v63, %v1535_v53  ;;  %v451_v1 = vpop.f32.mrb[21].mxu0 }
 0x110   : > { %v452_v2 = vadd.f32 %v451_v1, %v1537_v54  ;;  %v453_v3 = vpop.f32.mrb[22].mxu0  ;;  %725 = vmatprep.mubr.bf16.mxu1 %v519_v62 }
 0x111   : > { %v454_v4 = vadd.f32 %v453_v3, %v1535_v53  ;;  %v455_v5 = vpop.f32.mrb[23].mxu0  ;;  %726 = vmatmul.mubr.bf16.gmra.mrb[16].mxu1 %v518_v61  ;;  %v498_v7 = vmax.f32 %v450_v0, 0.0 }
 0x112   : > { %v456_v6 = vadd.f32 %v455_v5, %v1537_v54  ;;  %v499_v9 = vmax.f32 %v452_v2, 0.0 }
 0x113   : > { %v500_v8 = vmax.f32 %v454_v4, 0.0 }
 0x114   : > { %v501_v10 = vmax.f32 %v456_v6, 0.0 }
 0x115   : > { %v520_v11 = vpack.c.bf16 %v500_v8, %v498_v7 }
 0x116   : > { %v521_v12 = vpack.c.bf16 %v501_v10, %v499_v9  ;;  %v459_v13 = vpop.f32.mrb[24].mxu0 }
 0x117   : > { %v460_v14 = vadd.f32 %v459_v13, %v1535_v53  ;;  %v461_v15 = vpop.f32.mrb[25].mxu0 }
 0x118   : > { %v462_v16 = vadd.f32 %v461_v15, %v1537_v54  ;;  %v463_v17 = vpop.f32.mrb[26].mxu0  ;;  %733 = vmatprep.mubr.bf16.mxu1 %v521_v12 }
 0x119   : > { %v464_v18 = vadd.f32 %v463_v17, %v1535_v53  ;;  %v465_v19 = vpop.f32.mrb[27].mxu0  ;;  %734 = vmatmul.mubr.bf16.gmra.mrb[20].mxu1 %v520_v11  ;;  %v502_v21 = vmax.f32 %v460_v14, 0.0 }
 0x11a   : > { %v466_v20 = vadd.f32 %v465_v19, %v1537_v54  ;;  %v503_v23 = vmax.f32 %v462_v16, 0.0 }
 0x11b   : > { %v504_v22 = vmax.f32 %v464_v18, 0.0 }
 0x11c   : > { %v505_v24 = vmax.f32 %v466_v20, 0.0 }
 0x11d   : > { %v522_v25 = vpack.c.bf16 %v504_v22, %v502_v21 }
 0x11e   : > { %v523_v26 = vpack.c.bf16 %v505_v24, %v503_v23  ;;  %v469_v27 = vpop.f32.mrb[28].mxu0 }
 0x11f   : > { %v470_v28 = vadd.f32 %v469_v27, %v1535_v53  ;;  %v471_v29 = vpop.f32.mrb[29].mxu0 }
 0x120   : > { %v472_v30 = vadd.f32 %v471_v29, %v1537_v54  ;;  %v473_v31 = vpop.f32.mrb[30].mxu0  ;;  %741 = vmatprep.mubr.bf16.mxu1 %v523_v26 }
 0x121   : > { %v474_v32 = vadd.f32 %v473_v31, %v1535_v53  ;;  %v475_v33 = vpop.f32.mrb[31].mxu0  ;;  %742 = vmatmul.mubr.bf16.gmra.mrb[24].mxu1 %v522_v25  ;;  %v506_v35 = vmax.f32 %v470_v28, 0.0  ;;  %v1326_v53 = vld [vmem:[%s1689_s5 + $0x20] sm:$0xff]  }
 0x122   : > { %v476_v34 = vadd.f32 %v475_v33, %v1537_v54  ;;  %v507_v37 = vmax.f32 %v472_v30, 0.0  ;;  %1267 = vmatprep.subr.bf16.mxu0 %v1326_v53  ;;  %v1327_v54 = vld [vmem:[%s1689_s5 + $0x28] sm:$0xff]  }
 0x123   : > { %v508_v36 = vmax.f32 %v474_v32, 0.0  ;;  %1268 = vmatpush3.bf16.msra.mxu0 %v1326_v53 }
 0x124   : > { %v509_v38 = vmax.f32 %v476_v34, 0.0  ;;  %1269 = vmatprep.subr.bf16.mxu0 %v1327_v54 }
 0x125   : > { %v524_v39 = vpack.c.bf16 %v508_v36, %v506_v35 }
 0x126   : > { %v525_v40 = vpack.c.bf16 %v509_v38, %v507_v37 }
 0x127   : > { %1270 = vmatpush3.bf16.msra.mxu0 %v1327_v54 }
 0x128   : > { %749 = vmatprep.mubr.bf16.mxu1 %v525_v40  ;;  %1271 = vmatprep.subr.bf16.mxu0 %v1328_v42 }
 0x129   : > { %750 = vmatmul.mubr.bf16.gmra.mrb[28].mxu1 %v524_v39 }
 0x12b   : > { %1272 = vmatpush3.bf16.msra.mxu0 %v1328_v42 }
 0x12c   : > { %1273 = vmatprep.subr.bf16.mxu0 %v1329_v43 }
 0x12f   : > { %1274 = vmatpush3.bf16.msra.mxu0 %v1329_v43 }
 0x1c4   : > { %v1195_v44 = vpop.f32.mrb[0].mxu1 }
 0x1c5   : > { %v1196_v46 = vpop.f32.mrb[1].mxu1 }
 0x1c6   : > { %v1197_v47 = vadd.f32 %v1196_v46, %v1195_v44  ;;  %v1198_v48 = vpop.f32.mrb[2].mxu1 }
 0x1c7   : > { %v1199_v49 = vpop.f32.mrb[3].mxu1 }
 0x1c8   : > { %v696_v50 = vadd.f32 %v1197_v47, %v1589_v45  ;;  %v1200_v51 = vadd.f32 %v1199_v49, %v1198_v48 }
 0x1ca   : > { %v699_v52 = vadd.f32 %v1200_v51, %v1589_v45  ;;  %v758_v55 = vmax.f32 %v696_v50, 0.0 }
 0x1cc   : > { %v759_v56 = vmax.f32 %v699_v52, 0.0  ;;  %v1201_v57 = vpop.f32.mrb[4].mxu1 }
 0x1cd   : > { %v1202_v58 = vpop.f32.mrb[5].mxu1 }
 0x1ce   : > { %v1203_v59 = vadd.f32 %v1202_v58, %v1201_v57  ;;  %v1204_v60 = vpop.f32.mrb[6].mxu1  ;;  %v774_v61 = vpack.c.bf16 %v759_v56, %v758_v55 }
 0x1cf   : > { %v1205_v62 = vpop.f32.mrb[7].mxu1 }
 0x1d0   : > { %v704_v63 = vadd.f32 %v1203_v59, %v1589_v45  ;;  %v1206_v0 = vadd.f32 %v1205_v62, %v1204_v60  ;;  %1275 = vmatprep.mubr.bf16.mxu0 %v774_v61 }
 0x1d2   : > { %v707_v1 = vadd.f32 %v1206_v0, %v1589_v45  ;;  %v760_v2 = vmax.f32 %v704_v63, 0.0 }
 0x1d4   : > { %v761_v3 = vmax.f32 %v707_v1, 0.0  ;;  %v1207_v4 = vpop.f32.mrb[8].mxu1 }
 0x1d5   : > { %v1208_v5 = vpop.f32.mrb[9].mxu1 }
 0x1d6   : > { %v775_v6 = vpack.c.bf16 %v761_v3, %v760_v2  ;;  %v1209_v7 = vadd.f32 %v1208_v5, %v1207_v4  ;;  %v1210_v8 = vpop.f32.mrb[10].mxu1 }
 0x1d7   : > { %v1211_v9 = vpop.f32.mrb[11].mxu1 }
 0x1d8   : > { %v712_v10 = vadd.f32 %v1209_v7, %v1589_v45  ;;  %v1212_v11 = vadd.f32 %v1211_v9, %v1210_v8  ;;  %1276 = vmatmul.mubr.bf16.vlgmr.msra.gmra.mrb[32].mxu0 %v775_v6 }
 0x1da   : > { %v715_v12 = vadd.f32 %v1212_v11, %v1589_v45  ;;  %v762_v13 = vmax.f32 %v712_v10, 0.0 }
 0x1dc   : > { %v763_v14 = vmax.f32 %v715_v12, 0.0  ;;  %v1213_v15 = vpop.f32.mrb[12].mxu1  ;;  %v1166_v12 = vld [vmem:[%s1690_s6] ss:$0 sm:$0xff] }
 0x1dd   : > { %v1214_v16 = vpop.f32.mrb[13].mxu1 }
 0x1de   : > { %v1215_v17 = vadd.f32 %v1214_v16, %v1213_v15  ;;  %v1216_v18 = vpop.f32.mrb[14].mxu1  ;;  %v776_v19 = vpack.c.bf16 %v763_v14, %v762_v13 }
 0x1df   : > { %v1217_v20 = vpop.f32.mrb[15].mxu1 }
 0x1e0   : > { %v720_v21 = vadd.f32 %v1215_v17, %v1589_v45  ;;  %v1218_v22 = vadd.f32 %v1217_v20, %v1216_v18  ;;  %1279 = vmatprep.mubr.bf16.mxu0 %v776_v19 }
 0x1e2   : > { %v723_v23 = vadd.f32 %v1218_v22, %v1589_v45  ;;  %v764_v24 = vmax.f32 %v720_v21, 0.0 }
 0x1e4   : > { %v765_v25 = vmax.f32 %v723_v23, 0.0  ;;  %v1219_v26 = vpop.f32.mrb[16].mxu1 }
 0x1e5   : > { %v1220_v27 = vpop.f32.mrb[17].mxu1 }
 0x1e6   : > { %v1221_v28 = vadd.f32 %v1220_v27, %v1219_v26  ;;  %v1222_v29 = vpop.f32.mrb[18].mxu1  ;;  %v777_v30 = vpack.c.bf16 %v765_v25, %v764_v24 }
 0x1e7   : > { %v1223_v31 = vpop.f32.mrb[19].mxu1 }
 0x1e8   : > { %v728_v32 = vadd.f32 %v1221_v28, %v1589_v45  ;;  %v1224_v33 = vadd.f32 %v1223_v31, %v1222_v29  ;;  %1280 = vmatmul.mubr.bf16.gmra.mrb[36].mxu0 %v777_v30 }
 0x1ea   : > { %v731_v34 = vadd.f32 %v1224_v33, %v1589_v45  ;;  %v766_v35 = vmax.f32 %v728_v32, 0.0 }
 0x1ec   : > { %v767_v36 = vmax.f32 %v731_v34, 0.0  ;;  %v1225_v37 = vpop.f32.mrb[20].mxu1 }
 0x1ed   : > { %v1226_v38 = vpop.f32.mrb[21].mxu1 }
 0x1ee   : > { %v1227_v39 = vadd.f32 %v1226_v38, %v1225_v37  ;;  %v1228_v40 = vpop.f32.mrb[22].mxu1  ;;  %v778_v41 = vpack.c.bf16 %v767_v36, %v766_v35 }
 0x1ef   : > { %v1229_v53 = vpop.f32.mrb[23].mxu1 }
 0x1f0   : > { %v736_v54 = vadd.f32 %v1227_v39, %v1589_v45  ;;  %v1230_v42 = vadd.f32 %v1229_v53, %v1228_v40  ;;  %1283 = vmatprep.mubr.bf16.mxu0 %v778_v41 }
 0x1f2   : > { %v739_v43 = vadd.f32 %v1230_v42, %v1589_v45  ;;  %v768_v44 = vmax.f32 %v736_v54, 0.0 }
 0x1f4   : > { %v769_v46 = vmax.f32 %v739_v43, 0.0  ;;  %v1231_v47 = vpop.f32.mrb[24].mxu1 }
 0x1f5   : > { %v1232_v48 = vpop.f32.mrb[25].mxu1 }
 0x1f6   : > { %v1233_v49 = vadd.f32 %v1232_v48, %v1231_v47  ;;  %v1234_v50 = vpop.f32.mrb[26].mxu1  ;;  %v779_v51 = vpack.c.bf16 %v769_v46, %v768_v44 }
 0x1f7   : > { %v1235_v52 = vpop.f32.mrb[27].mxu1 }
 0x1f8   : > { %v744_v55 = vadd.f32 %v1233_v49, %v1589_v45  ;;  %v1236_v56 = vadd.f32 %v1235_v52, %v1234_v50  ;;  %1284 = vmatmul.mubr.bf16.gmra.mrb[40].mxu0 %v779_v51 }
 0x1fa   : > { %v747_v57 = vadd.f32 %v1236_v56, %v1589_v45  ;;  %v770_v58 = vmax.f32 %v744_v55, 0.0 }
 0x1fc   : > { %v771_v59 = vmax.f32 %v747_v57, 0.0  ;;  %v1237_v60 = vpop.f32.mrb[28].mxu1 }
 0x1fd   : > { %v1238_v61 = vpop.f32.mrb[29].mxu1 }
 0x1fe   : > { %v1239_v62 = vadd.f32 %v1238_v61, %v1237_v60  ;;  %v1240_v63 = vpop.f32.mrb[30].mxu1  ;;  %v780_v0 = vpack.c.bf16 %v771_v59, %v770_v58 }
 0x1ff   : > { %v1241_v1 = vpop.f32.mrb[31].mxu1 }
 0x200   : > { %v752_v2 = vadd.f32 %v1239_v62, %v1589_v45  ;;  %v1242_v3 = vadd.f32 %v1241_v1, %v1240_v63  ;;  %1287 = vmatprep.mubr.bf16.mxu0 %v780_v0 }
 0x202   : > { %v755_v4 = vadd.f32 %v1242_v3, %v1589_v45  ;;  %v772_v5 = vmax.f32 %v752_v2, 0.0 }
 0x204   : > { %v773_v6 = vmax.f32 %v755_v4, 0.0 }
 0x206   : > { %v781_v7 = vpack.c.bf16 %v773_v6, %v772_v5 }
 0x208   : > { %1288 = vmatmul.mubr.bf16.gmra.mrb[44].mxu0 %v781_v7 }
 0x2ab   : > { %v1277_v8 = vpop.f32.mrb[32].mxu0 }
 0x2ac   : > { %v887_v9 = vpop.f32.mrb[33].mxu0  ;;  %v1610_v14 = vadd.f32 %v1277_v8, %v1166_v12 }
 0x2ad   : > { %v1278_v10 = vpop.f32.mrb[34].mxu0  ;;  %v888_v17 = vadd.f32 %v1166_v12, %v887_v9 }
 0x2ae   : > { %v890_v11 = vpop.f32.mrb[35].mxu0  ;;  %v1616_v19 = vadd.f32 %v1278_v10, %v1166_v12 }
 0x2af   : > { %v891_v23 = vadd.f32 %v1166_v12, %v890_v11 }
 0x2bb   : > { %v1281_v13 = vpop.f32.mrb[36].mxu0 }
 0x2bc   : > { %v1612_v15 = vadd.f32 %v1281_v13, %v1166_v12  ;;  %v903_v16 = vpop.f32.mrb[37].mxu0 }
 0x2bd   : > { %v1614_v45 = vadd.f32 %v1166_v12, %v903_v16  ;;  %v1282_v18 = vpop.f32.mrb[38].mxu0 }
 0x2be   : > { %v952_v20 = vmax.f32 %v1610_v14, %v1612_v15  ;;  %v1620_v21 = vadd.f32 %v1282_v18, %v1166_v12  ;;  %v906_v22 = vpop.f32.mrb[39].mxu0 }
 0x2bf   : > { %v950_v24 = vmax.f32 %v888_v17, %v1614_v45  ;;  %v907_v25 = vadd.f32 %v1166_v12, %v906_v22 }
 0x2c0   : > { %v953_v26 = vmax.f32 %v1616_v19, %v1620_v21 }
 0x2c1   : > { %v951_v27 = vmax.f32 %v891_v23, %v907_v25 }
 0x2cb   : > { %v1285_v28 = vpop.f32.mrb[40].mxu0 }
 0x2cc   : > { %v1625_v29 = vadd.f32 %v1285_v28, %v1166_v12  ;;  %v919_v30 = vpop.f32.mrb[41].mxu0 }
 0x2cd   : > { %v1627_v31 = vadd.f32 %v1166_v12, %v919_v30  ;;  %v1286_v32 = vpop.f32.mrb[42].mxu0 }
 0x2ce   : > { %v956_v33 = vmax.f32 %v952_v20, %v1625_v29  ;;  %v1630_v34 = vadd.f32 %v1286_v32, %v1166_v12  ;;  %v922_v35 = vpop.f32.mrb[43].mxu0 }
 0x2cf   : > { %v954_v36 = vmax.f32 %v950_v24, %v1627_v31  ;;  %v923_v37 = vadd.f32 %v1166_v12, %v922_v35 }
 0x2d0   : > { %v957_v38 = vmax.f32 %v953_v26, %v1630_v34 }
 0x2d1   : > { %v955_v39 = vmax.f32 %v951_v27, %v923_v37 }
 0x2db   : > { %v1289_v40 = vpop.f32.mrb[44].mxu0 }
 0x2dc   : > { %v1634_v41 = vadd.f32 %v1289_v40, %v1166_v12  ;;  %v935_v53 = vpop.f32.mrb[45].mxu0 }
 0x2dd   : > { %v1636_v54 = vadd.f32 %v1166_v12, %v935_v53  ;;  %v1290_v42 = vpop.f32.mrb[46].mxu0 }
 0x2de   : > { %v960_v43 = vmax.f32 %v956_v33, %v1634_v41  ;;  %v1639_v44 = vadd.f32 %v1290_v42, %v1166_v12  ;;  %v938_v46 = vpop.f32.mrb[47].mxu0 }
 0x2df   : > { %v958_v47 = vmax.f32 %v954_v36, %v1636_v54  ;;  %v1642_v48 = vadd.f32 %v1166_v12, %v938_v46 }
 0x2e0   : > { %v961_v49 = vmax.f32 %v957_v38, %v1639_v44 }
 0x2e1   : > { %v959_v50 = vmax.f32 %v955_v39, %v1642_v48 }
 0x2e2   : > { %v963_v51 = vmax.f32 %v960_v43, %v961_v49 }
 0x2e3   : > { %v962_v52 = vmax.f32 %v958_v47, %v959_v50 }
 0x2e5   : > { %v964_v55 = vmax.f32 %v962_v52, %v963_v51 }
 0x2e7   : > { %v965_v56 = vrot.slane %v964_v55, 4 }
 0x2e9   : > { %v966_v57 = vmax.f32 %v964_v55, %v965_v56 }
 0x2eb   : > { %v967_v58 = vrot.slane %v966_v57, 2 }
 0x2ed   : > { %v968_v59 = vmax.f32 %v966_v57, %v967_v58 }
 0x2ef   : > { %v969_v60 = vrot.slane %v968_v59, 1 }
 0x2f1   : > { %v970_v61 = vmax.f32 %v968_v59, %v969_v60 }
 0x2f3   : > { %v971_v62 = vsub.f32 %v888_v17, %v970_v61  ;;  %v972_v63 = vsub.f32 %v891_v23, %v970_v61  ;;  %v973_v0 = vsub.f32 %v1610_v14, %v970_v61  ;;  %v974_v1 = vsub.f32 %v1616_v19, %v970_v61 }
 0x2f4   : > { %v975_v2 = vsub.f32 %v1614_v45, %v970_v61  ;;  %v976_v3 = vsub.f32 %v907_v25, %v970_v61  ;;  %v977_v4 = vsub.f32 %v1612_v15, %v970_v61  ;;  %v978_v5 = vsub.f32 %v1620_v21, %v970_v61 }
 0x2f5   : > { %v979_v6 = vsub.f32 %v1627_v31, %v970_v61  ;;  %v980_v7 = vsub.f32 %v923_v37, %v970_v61  ;;  %v981_v8 = vsub.f32 %v1625_v29, %v970_v61  ;;  %v982_v9 = vsub.f32 %v1630_v34, %v970_v61 }
 0x2f6   : > { %v983_v10 = vsub.f32 %v1636_v54, %v970_v61  ;;  %v984_v11 = vsub.f32 %v1642_v48, %v970_v61  ;;  %v985_v12 = vsub.f32 %v1634_v41, %v970_v61  ;;  %v986_v13 = vsub.f32 %v1639_v44, %v970_v61 }
 0x2f7   : > { %v987_v14 = vmul.f32 1.442695, %v971_v62  ;;  %v989_v16 = vmul.f32 1.442695, %v972_v63  ;;  %v991_v15 = vmul.f32 1.442695, %v973_v0 }
 0x2f8   : > { %v993_v17 = vmul.f32 1.442695, %v974_v1  ;;  %v995_v45 = vmul.f32 1.442695, %v975_v2  ;;  %v997_v18 = vmul.f32 1.442695, %v976_v3 }
 0x2f9   : > { %1330 = vpow2.f32 %v987_v14  ;;  %v999_v19 = vmul.f32 1.442695, %v977_v4  ;;  %v1001_v20 = vmul.f32 1.442695, %v978_v5  ;;  %v1003_v23 = vmul.f32 1.442695, %v979_v6 }
 0x2fa   : > { %1332 = vpow2.f32 %v989_v16  ;;  %v1005_v26 = vmul.f32 1.442695, %v980_v7  ;;  %v1007_v29 = vmul.f32 1.442695, %v981_v8  ;;  %v1009_v32 = vmul.f32 1.442695, %v982_v9 }
 0x2fb   : > { %1334 = vpow2.f32 %v991_v15  ;;  %v1011_v35 = vmul.f32 1.442695, %v983_v10  ;;  %v1013_v38 = vmul.f32 1.442695, %v984_v11  ;;  %v1015_v41 = vmul.f32 1.442695, %v985_v12 }
 0x2fc   : > { %1336 = vpow2.f32 %v993_v17  ;;  %v1017_v42 = vmul.f32 1.442695, %v986_v13 }
 0x2fd   : > { %1338 = vpow2.f32 %v995_v45 }
 0x2fe   : > { %1340 = vpow2.f32 %v997_v18 }
 0x2ff   : > { %1342 = vpow2.f32 %v999_v19 }
 0x300   : > { %1344 = vpow2.f32 %v1001_v20 }
 0x301   : > { %1346 = vpow2.f32 %v1003_v23 }
 0x302   : > { %1348 = vpow2.f32 %v1005_v26 }
 0x303   : > { %v1331_v21 = vpop.eup %1330  ;;  %1350 = vpow2.f32 %v1007_v29 }
 0x304   : > { %v1333_v22 = vpop.eup %1332  ;;  %1352 = vpow2.f32 %v1009_v32 }
 0x305   : > { %v1019_v24 = vadd.f32 %v1333_v22, %v1331_v21  ;;  %v1335_v25 = vpop.eup %1334  ;;  %1354 = vpow2.f32 %v1011_v35 }
 0x306   : > { %v1337_v28 = vpop.eup %1336  ;;  %1356 = vpow2.f32 %v1013_v38 }
 0x307   : > { %v1020_v27 = vadd.f32 %v1335_v25, %v1019_v24  ;;  %v1339_v31 = vpop.eup %1338  ;;  %1358 = vpow2.f32 %v1015_v41 }
 0x308   : > { %v1341_v34 = vpop.eup %1340  ;;  %1360 = vpow2.f32 %v1017_v42 }
 0x309   : > { %v1021_v30 = vadd.f32 %v1337_v28, %v1020_v27  ;;  %v1343_v37 = vpop.eup %1342 }
 0x30a   : > { %v1345_v40 = vpop.eup %1344 }
 0x30b   : > { %v1022_v33 = vadd.f32 %v1339_v31, %v1021_v30  ;;  %v1347_v54 = vpop.eup %1346 }
 0x30c   : > { %v1349_v44 = vpop.eup %1348 }
 0x30d   : > { %v1023_v36 = vadd.f32 %v1341_v34, %v1022_v33  ;;  %v1351_v47 = vpop.eup %1350 }
 0x30e   : > { %v1353_v49 = vpop.eup %1352 }
 0x30f   : > { %v1024_v39 = vadd.f32 %v1343_v37, %v1023_v36  ;;  %v1355_v51 = vpop.eup %1354 }
 0x310   : > { %v1357_v55 = vpop.eup %1356 }
 0x311   : > { %v1025_v53 = vadd.f32 %v1345_v40, %v1024_v39  ;;  %v1359_v57 = vpop.eup %1358 }
 0x312   : > { %v1361_v59 = vpop.eup %1360 }
 0x313   : > { %v1026_v43 = vadd.f32 %v1347_v54, %v1025_v53 }
 0x315   : > { %v1027_v46 = vadd.f32 %v1349_v44, %v1026_v43 }
 0x317   : > { %v1028_v48 = vadd.f32 %v1351_v47, %v1027_v46 }
 0x319   : > { %v1029_v50 = vadd.f32 %v1353_v49, %v1028_v48 }
 0x31b   : > { %v1030_v52 = vadd.f32 %v1355_v51, %v1029_v50 }
 0x31d   : > { %v1031_v56 = vadd.f32 %v1357_v55, %v1030_v52 }
 0x31f   : > { %v1032_v58 = vadd.f32 %v1359_v57, %v1031_v56 }
 0x321   : > { %v1033_v60 = vadd.f32 %v1361_v59, %v1032_v58 }
 0x323   : > { %v1034_v61 = vrot.slane %v1033_v60, 4 }
 0x325   : > { %v1035_v62 = vadd.f32 %v1034_v61, %v1033_v60 }
 0x327   : > { %v1036_v63 = vrot.slane %v1035_v62, 2 }
 0x329   : > { %v1037_v0 = vadd.f32 %v1036_v63, %v1035_v62 }
 0x32b   : > { %v1038_v1 = vrot.slane %v1037_v0, 1 }
 0x32d   : > { %v1039_v2 = vadd.f32 %v1038_v1, %v1037_v0 }
 0x32f   : > { %1362 = vrcp.f32 %v1039_v2 }
 0x339   : > { %v1363_v3 = vpop.eup %1362 }
 0x33a   : > { %v1041_v4 = vmul.f32 %v1363_v3, %v1331_v21  ;;  %v1042_v5 = vmul.f32 %v1363_v3, %v1333_v22  ;;  %v1043_v6 = vmul.f32 %v1363_v3, %v1335_v25  ;;  %v1044_v7 = vmul.f32 %v1363_v3, %v1337_v28 }
 0x33b   : > { %v1045_v8 = vmul.f32 %v1363_v3, %v1339_v31  ;;  %v1046_v9 = vmul.f32 %v1363_v3, %v1341_v34  ;;  %v1047_v10 = vmul.f32 %v1363_v3, %v1343_v37  ;;  %v1048_v11 = vmul.f32 %v1363_v3, %v1345_v40 }
 0x33c   : > { %v1049_v12 = vmul.f32 %v1363_v3, %v1347_v54  ;;  %v1050_v13 = vmul.f32 %v1363_v3, %v1349_v44  ;;  %v1051_v14 = vmul.f32 %v1363_v3, %v1351_v47  ;;  %v1052_v16 = vmul.f32 %v1363_v3, %v1353_v49  ;;  %1057 = vst [vmem:[%s1663_s10] sm:$0xff] %v1041_v4 }
 0x33d   : > { %1058 = vst [vmem:[%s1663_s10 + $0x8] sm:$0xff] %v1042_v5  ;;  %1059 = vst [vmem:[%s1663_s10 + $0x10] sm:$0xff] %v1043_v6  ;;  %v1053_v15 = vmul.f32 %v1363_v3, %v1355_v51  ;;  %v1054_v17 = vmul.f32 %v1363_v3, %v1357_v55  ;;  %v1055_v45 = vmul.f32 %v1363_v3, %v1359_v57 }
 0x33e   : > { %1060 = vst [vmem:[%s1663_s10 + $0x18] sm:$0xff] %v1044_v7  ;;  %v1056_v18 = vmul.f32 %v1363_v3, %v1361_v59  ;;  %1061 = vst [vmem:[%s1663_s10 + $0x20] sm:$0xff] %v1045_v8 }
 0x33f   : > { %1062 = vst [vmem:[%s1663_s10 + $0x28] sm:$0xff] %v1046_v9  ;;  %1063 = vst [vmem:[%s1663_s10 + $0x30] sm:$0xff] %v1047_v10 }
 0x340   : > { %1064 = vst [vmem:[%s1663_s10 + $0x38] sm:$0xff] %v1048_v11  ;;  %1065 = vst [vmem:[%s1663_s10 + $0x40] sm:$0xff] %v1049_v12 }
 0x341   : > { %1066 = vst [vmem:[%s1663_s10 + $0x48] sm:$0xff] %v1050_v13  ;;  %1067 = vst [vmem:[%s1663_s10 + $0x50] sm:$0xff] %v1051_v14 }
 0x342   : > { %1068 = vst [vmem:[%s1663_s10 + $0x58] sm:$0xff] %v1052_v16  ;;  %1069 = vst [vmem:[%s1663_s10 + $0x60] sm:$0xff] %v1053_v15 }
 0x343   : > { %1070 = vst [vmem:[%s1663_s10 + $0x68] sm:$0xff] %v1054_v17  ;;  %1071 = vst [vmem:[%s1663_s10 + $0x70] sm:$0xff] %v1055_v45 }
 0x344   : > { %1072 = vst [vmem:[%s1663_s10 + $0x78] sm:$0xff] %v1056_v18 }
 0x345 PF: > { %s17_s24 = sadd.s32 1, %s1370_s24  }
 0x346   : > { %p14_p4 = scmp.ge.s32.totalorder %s17_s24, 10  }
 0x348   :  { %16 = sbr.rel (!%p14_p4) target bundleno = 1 (0x1), region = 78 }

</bundles_post_ra>
